<compile_context>
chip_gen: v5e
topology: v5e:2x2
jax: 0.10.0
libtpu: 0.0.40
codegen_flags: <defaults>
</compile_context>

<pallas_src>
import math
import functools
import numpy as np
import jax
import jax.numpy as jnp
from jax import lax
from jax.experimental import pallas as pl
from jax.experimental.pallas import tpu as pltpu


# ----------------------------------------------------------------------------
# Pallas kernel: single-output-channel dilated conv, flat-lane formulation.
#
#   w_ref : (C*KH*KW,)  f32 in SMEM   (scalar weight taps)
#   x_ref : (C, Nb, L)  f32 in VMEM,  L = Hp*Wp  (lane axis)
#   o_ref : (Nb, L)     f32 in VMEM
#
# For flat position p = h*Wp + w, the tap (c, ih, iw) contributes
#   x[c, n, p + ih*dh*Wp + iw*dw] * w[c, ih, iw]
# i.e. a lane roll of the per-channel slab by -(ih*dh*Wp + iw*dw).
# Positions whose w-coordinate >= W_out pick up row-crossing garbage; the
# wrapper discards them.  (max valid p) + (max shift) == L-1, so the roll
# wrap-around never contaminates a valid output position.
# ----------------------------------------------------------------------------
def _decent_conv_kernel(w_ref, x_ref, o_ref, *, n_ch, kh, kw, dh, dw, wp):
    nb, L = o_ref.shape
    x = x_ref[...]                                   # (n_ch, nb, L)
    acc = jnp.zeros((nb, L), jnp.float32)
    for ci in range(n_ch):
        xc = x[ci]                                   # leading-axis slice: free
        for ih in range(kh):
            for iw in range(kw):
                s = ih * dh * wp + iw * dw
                # Lane rotation on the XLU; positive shift (L - s) == -s mod L.
                tap = xc if s == 0 else pltpu.roll(xc, L - s, axis=1)
                # Scalar weight straight from SMEM -> vector*scalar multiply.
                acc = acc + tap * w_ref[ci * kh * kw + ih * kw + iw]
    o_ref[...] = acc.astype(o_ref.dtype)


_PAD_JNP_MODE = {"zeros": "constant", "reflect": "reflect",
                 "replicate": "edge", "circular": "wrap"}


def decent_conv2d(x_sel, w_sel, *, stride=(1, 1), padding=(0, 0),
                  dilation=(3, 3), padding_mode="zeros"):
    """Single-output-channel conv2d (NCHW) via Pallas.

    x_sel: (N, C, H, W), w_sel: (1, C, KH, KW) -> (N, 1, H_out, W_out)
    """
    n, c, h, w = x_sel.shape
    _, cw, kh, kw = w_sel.shape
    assert c == cw
    sh, sw = stride
    dh, dw = dilation

    # ---- padding (glue, outside the kernel) ----
    if isinstance(padding, str):
        if padding == "valid":
            pads = ((0, 0), (0, 0))
        elif padding == "same":
            th, tw = dh * (kh - 1), dw * (kw - 1)
            pads = ((th // 2, th - th // 2), (tw // 2, tw - tw // 2))
        else:
            raise ValueError(f"invalid padding string {padding!r}")
    else:
        ph, pw = padding
        pads = ((ph, ph), (pw, pw))
    if any(v for pair in pads for v in pair):
        x_sel = jnp.pad(x_sel, ((0, 0), (0, 0), pads[0], pads[1]),
                        mode=_PAD_JNP_MODE[padding_mode])
    hp = h + pads[0][0] + pads[0][1]
    wp = w + pads[1][0] + pads[1][1]

    h1 = hp - dh * (kh - 1)        # stride-1 output extents
    w1 = wp - dw * (kw - 1)
    assert h1 > 0 and w1 > 0, "kernel does not fit in (padded) input"
    L = hp * wp

    # Channel-leading flat layout: (C, N, Hp*Wp). Lane axis = Hp*Wp.
    x_flat = jnp.transpose(x_sel, (1, 0, 2, 3)).reshape(c, n, L)
    w_flat = w_sel.reshape(c * kh * kw)

    # Batch rows per grid step: whole batch when small (amortize per-step
    # overhead), else sublane-aligned blocks of 8; grid axis is 'parallel'.
    nb = n if n <= 8 else 8
    num_blocks = pl.cdiv(n, nb)

    kernel = functools.partial(_decent_conv_kernel, n_ch=c, kh=kh, kw=kw,
                               dh=dh, dw=dw, wp=wp)

    itemsize = jnp.dtype(x_flat.dtype).itemsize
    vmem_need = 2 * (c * nb * L * itemsize) + 2 * (nb * L * itemsize) + (2 << 20)
    # TODO(synk): for large C/H/W (esp. v7x's 64 MiB VMEM) add a channel- or
    # H-band grid axis with an f32 accumulator + pl.when init/finalize instead
    # of a single full slab per step.

    out_flat = pl.pallas_call(
        kernel,
        out_shape=jax.ShapeDtypeStruct((n, L), x_flat.dtype),
        grid_spec=pltpu.PrefetchScalarGridSpec(
            num_scalar_prefetch=0,
            grid=(num_blocks,),
            in_specs=[
                pl.BlockSpec(memory_space=pltpu.MemorySpace.SMEM),   # weights
                pl.BlockSpec((c, nb, L), lambda b: (0, b, 0)),       # input
            ],
            out_specs=pl.BlockSpec((nb, L), lambda b: (b, 0)),
        ),
        compiler_params=pltpu.CompilerParams(
            dimension_semantics=("parallel",),
            vmem_limit_bytes=int(min(64 * 1024 * 1024,
                                     max(4 * 1024 * 1024, vmem_need))),
        ),
    )(w_flat, x_flat)

    # Undo the flat layout; drop the garbage columns (w >= w1) / rows (h >= h1).
    out = out_flat.reshape(n, hp, wp)[:, :h1, :w1][:, None, :, :]
    if sh != 1 or sw != 1:
        # TODO(synk): stride>1 still computes the stride-1 result and
        # subsamples; a stride-phased input split would avoid the sh*sw waste.
        out = out[:, :, ::sh, ::sw]
    return out


# ----------------------------------------------------------------------------
# DecentFilter module (JAX re-implementation of the PyTorch nn.Module).
# ----------------------------------------------------------------------------
class DecentInput:
    """Mimics the input object expected by DecentFilter.forward."""
    def __init__(self, data, ms_x, ns_x):
        self.data = data
        self.ms_x = list(ms_x)
        self.ns_x = list(ns_x)


class DecentFilterJAX:
    def __init__(self, ms_in, ns_in, m_this, n_this, *, kernel_size=3, stride=1,
                 padding=0, padding_mode="zeros", dilation=3, key=None):
        assert len(ms_in) == len(ns_in), "ms_in and ns_in are not of same length"
        self.ms_in = list(ms_in)
        self.ns_in = list(ns_in)
        self.m_this = float(m_this)
        self.n_this = float(n_this)
        self.kernel_size = (kernel_size, kernel_size)
        self.stride = (stride, stride) if isinstance(stride, int) else tuple(stride)
        self.padding = padding if isinstance(padding, str) else (
            (padding, padding) if isinstance(padding, int) else tuple(padding))
        self.padding_mode = padding_mode
        self.dilation = (dilation, dilation) if isinstance(dilation, int) else tuple(dilation)
        self.n_weights = len(ms_in)

        # kaiming_uniform_(a=sqrt(5)) on shape (1, n_weights, KH, KW)
        # => U(-1/sqrt(fan_in), 1/sqrt(fan_in)), fan_in = n_weights*KH*KW
        fan_in = self.n_weights * self.kernel_size[0] * self.kernel_size[1]
        bound = 1.0 / math.sqrt(fan_in)
        key = key if key is not None else jax.random.PRNGKey(0)
        self.weights = jax.random.uniform(
            key, (1, self.n_weights, *self.kernel_size),
            minval=-bound, maxval=bound, dtype=jnp.float32)

    def forward(self, x: DecentInput):
        common_pairs = [
            [i_in, i_x]
            for i_in, (m_in, n_in) in enumerate(zip(self.ms_in, self.ns_in))
            for i_x, (m_x, n_x) in enumerate(zip(x.ms_x, x.ns_x))
            if m_in == m_x and n_in == n_x
        ]
        common_pairs_np = np.array(common_pairs)
        try:
            f_ids = common_pairs_np[:, 0]
            x_ids = common_pairs_np[:, 1]
        except Exception:
            print("DECENT EXCEPTION: no common pairs")
            return None

        # Channel gather = glue in plain JAX.
        tmp_d = x.data[:, x_ids, :, :]
        tmp_w = self.weights[:, f_ids, :, :]

        # TODO(synk): batching many DecentFilters into one im2col+MXU matmul
        # (>=128 output channels per call) is the only path to MXU peak; a
        # single filter has one output channel so it stays on the VPU path.
        return decent_conv2d(
            tmp_d, tmp_w,
            stride=self.stride, padding=self.padding,
            dilation=self.dilation, padding_mode=self.padding_mode)


# ----------------------------------------------------------------------------
# Main
# ----------------------------------------------------------------------------
if __name__ == "__main__":
    key = jax.random.PRNGKey(0)
    k_w, k_x = jax.random.split(key)

    # Filter geometry (synthetic, deterministic).
    ms_in = [0.0, 1.0, 2.0, 3.0]
    ns_in = [0.0, 0.0, 1.0, 1.0]
    filt = DecentFilterJAX(ms_in, ns_in, m_this=4.0, n_this=2.0,
                           kernel_size=3, stride=1, padding=0, dilation=3,
                           key=k_w)

    # Input: batch=2, 4 channels at positions (ms_x, ns_x), spatial 16x16.
    N, C, H, W = 2, 4, 16, 16
    data = jax.random.normal(k_x, (N, C, H, W), dtype=jnp.float32)
    ms_x = [1.0, 2.0, 3.0, 5.0]
    ns_x = [0.0, 1.0, 1.0, 0.0]
    x = DecentInput(data, ms_x, ns_x)

    out = filt.forward(x)
    out = jax.block_until_ready(out)

    # Sanity check against XLA's dilated conv (reference only).
    common = [[i_in, i_x]
              for i_in, (m_in, n_in) in enumerate(zip(ms_in, ns_in))
              for i_x, (m_x, n_x) in enumerate(zip(ms_x, ns_x))
              if m_in == m_x and n_in == n_x]
    f_ids = np.array(common)[:, 0]
    x_ids = np.array(common)[:, 1]
    ref = lax.conv_general_dilated(
        data[:, x_ids], filt.weights[:, f_ids],
        window_strides=(1, 1), padding="VALID", rhs_dilation=(3, 3),
        dimension_numbers=("NCHW", "OIHW", "NCHW"))
    assert out.shape == ref.shape, (out.shape, ref.shape)
    assert np.allclose(np.asarray(out), np.asarray(ref), atol=1e-5, rtol=1e-5)

    print("KERNEL_OK")
</pallas_src>

<mosaic_0001>
module attributes {stable_mosaic.version = 11 : i64} {
  func.func @_decent_conv_kernel(%arg0: i32, %arg1: memref<27xf32, #tpu.memory_space<smem>>, %arg2: memref<3x2x256xf32, #tpu.memory_space<vmem>>, %arg3: memref<2x256xf32, #tpu.memory_space<vmem>>) attributes {dimension_semantics = [#tpu.dimension_semantics<parallel>], iteration_bounds = array<i64: 1>, scalar_prefetch = 0 : i64, scratch_operands = 0 : i64, tpu.core_type = #tpu.core_type<tc>, window_params = [{transform_indices = @transform_0, window_bounds = array<i64: 27>}, {transform_indices = @transform_1, window_bounds = array<i64: 3, 2, 256>}, {transform_indices = @transform_2, window_bounds = array<i64: 2, 256>}]} {
    %c0 = arith.constant 0 : index
    %c0_0 = arith.constant 0 : index
    %c0_1 = arith.constant 0 : index
    %0 = vector.load %arg2[%c0, %c0_0, %c0_1] : memref<3x2x256xf32, #tpu.memory_space<vmem>>, vector<3x2x256xf32>
    %cst = arith.constant 0.000000e+00 : f32
    %1 = vector.broadcast %cst : f32 to vector<2x256xf32>
    %2 = vector.extract_strided_slice %0 {offsets = [0, 0, 0], sizes = [1, 2, 256], strides = [1, 1, 1]} : vector<3x2x256xf32> to vector<1x2x256xf32>
    %3 = vector.shape_cast %2 : vector<1x2x256xf32> to vector<2x256xf32>
    %c0_2 = arith.constant 0 : index
    %4 = memref.load %arg1[%c0_2] : memref<27xf32, #tpu.memory_space<smem>>
    %5 = vector.broadcast %4 : f32 to vector<2x256xf32>
    %6 = arith.mulf %3, %5 : vector<2x256xf32>
    %7 = arith.addf %1, %6 : vector<2x256xf32>
    %c253_i32 = arith.constant 253 : i32
    %8 = tpu.dynamic_rotate %3 by %c253_i32 dim 1 : vector<2x256xf32>, i32 -> vector<2x256xf32>
    %c1 = arith.constant 1 : index
    %9 = memref.load %arg1[%c1] : memref<27xf32, #tpu.memory_space<smem>>
    %10 = vector.broadcast %9 : f32 to vector<2x256xf32>
    %11 = arith.mulf %8, %10 : vector<2x256xf32>
    %12 = arith.addf %7, %11 : vector<2x256xf32>
    %c250_i32 = arith.constant 250 : i32
    %13 = tpu.dynamic_rotate %3 by %c250_i32 dim 1 : vector<2x256xf32>, i32 -> vector<2x256xf32>
    %c2 = arith.constant 2 : index
    %14 = memref.load %arg1[%c2] : memref<27xf32, #tpu.memory_space<smem>>
    %15 = vector.broadcast %14 : f32 to vector<2x256xf32>
    %16 = arith.mulf %13, %15 : vector<2x256xf32>
    %17 = arith.addf %12, %16 : vector<2x256xf32>
    %c208_i32 = arith.constant 208 : i32
    %18 = tpu.dynamic_rotate %3 by %c208_i32 dim 1 : vector<2x256xf32>, i32 -> vector<2x256xf32>
    %c3 = arith.constant 3 : index
    %19 = memref.load %arg1[%c3] : memref<27xf32, #tpu.memory_space<smem>>
    %20 = vector.broadcast %19 : f32 to vector<2x256xf32>
    %21 = arith.mulf %18, %20 : vector<2x256xf32>
    %22 = arith.addf %17, %21 : vector<2x256xf32>
    %c205_i32 = arith.constant 205 : i32
    %23 = tpu.dynamic_rotate %3 by %c205_i32 dim 1 : vector<2x256xf32>, i32 -> vector<2x256xf32>
    %c4 = arith.constant 4 : index
    %24 = memref.load %arg1[%c4] : memref<27xf32, #tpu.memory_space<smem>>
    %25 = vector.broadcast %24 : f32 to vector<2x256xf32>
    %26 = arith.mulf %23, %25 : vector<2x256xf32>
    %27 = arith.addf %22, %26 : vector<2x256xf32>
    %c202_i32 = arith.constant 202 : i32
    %28 = tpu.dynamic_rotate %3 by %c202_i32 dim 1 : vector<2x256xf32>, i32 -> vector<2x256xf32>
    %c5 = arith.constant 5 : index
    %29 = memref.load %arg1[%c5] : memref<27xf32, #tpu.memory_space<smem>>
    %30 = vector.broadcast %29 : f32 to vector<2x256xf32>
    %31 = arith.mulf %28, %30 : vector<2x256xf32>
    %32 = arith.addf %27, %31 : vector<2x256xf32>
    %c160_i32 = arith.constant 160 : i32
    %33 = tpu.dynamic_rotate %3 by %c160_i32 dim 1 : vector<2x256xf32>, i32 -> vector<2x256xf32>
    %c6 = arith.constant 6 : index
    %34 = memref.load %arg1[%c6] : memref<27xf32, #tpu.memory_space<smem>>
    %35 = vector.broadcast %34 : f32 to vector<2x256xf32>
    %36 = arith.mulf %33, %35 : vector<2x256xf32>
    %37 = arith.addf %32, %36 : vector<2x256xf32>
    %c157_i32 = arith.constant 157 : i32
    %38 = tpu.dynamic_rotate %3 by %c157_i32 dim 1 : vector<2x256xf32>, i32 -> vector<2x256xf32>
    %c7 = arith.constant 7 : index
    %39 = memref.load %arg1[%c7] : memref<27xf32, #tpu.memory_space<smem>>
    %40 = vector.broadcast %39 : f32 to vector<2x256xf32>
    %41 = arith.mulf %38, %40 : vector<2x256xf32>
    %42 = arith.addf %37, %41 : vector<2x256xf32>
    %c154_i32 = arith.constant 154 : i32
    %43 = tpu.dynamic_rotate %3 by %c154_i32 dim 1 : vector<2x256xf32>, i32 -> vector<2x256xf32>
    %c8 = arith.constant 8 : index
    %44 = memref.load %arg1[%c8] : memref<27xf32, #tpu.memory_space<smem>>
    %45 = vector.broadcast %44 : f32 to vector<2x256xf32>
    %46 = arith.mulf %43, %45 : vector<2x256xf32>
    %47 = arith.addf %42, %46 : vector<2x256xf32>
    %48 = vector.extract_strided_slice %0 {offsets = [1, 0, 0], sizes = [1, 2, 256], strides = [1, 1, 1]} : vector<3x2x256xf32> to vector<1x2x256xf32>
    %49 = vector.shape_cast %48 : vector<1x2x256xf32> to vector<2x256xf32>
    %c9 = arith.constant 9 : index
    %50 = memref.load %arg1[%c9] : memref<27xf32, #tpu.memory_space<smem>>
    %51 = vector.broadcast %50 : f32 to vector<2x256xf32>
    %52 = arith.mulf %49, %51 : vector<2x256xf32>
    %53 = arith.addf %47, %52 : vector<2x256xf32>
    %c253_i32_3 = arith.constant 253 : i32
    %54 = tpu.dynamic_rotate %49 by %c253_i32_3 dim 1 : vector<2x256xf32>, i32 -> vector<2x256xf32>
    %c10 = arith.constant 10 : index
    %55 = memref.load %arg1[%c10] : memref<27xf32, #tpu.memory_space<smem>>
    %56 = vector.broadcast %55 : f32 to vector<2x256xf32>
    %57 = arith.mulf %54, %56 : vector<2x256xf32>
    %58 = arith.addf %53, %57 : vector<2x256xf32>
    %c250_i32_4 = arith.constant 250 : i32
    %59 = tpu.dynamic_rotate %49 by %c250_i32_4 dim 1 : vector<2x256xf32>, i32 -> vector<2x256xf32>
    %c11 = arith.constant 11 : index
    %60 = memref.load %arg1[%c11] : memref<27xf32, #tpu.memory_space<smem>>
    %61 = vector.broadcast %60 : f32 to vector<2x256xf32>
    %62 = arith.mulf %59, %61 : vector<2x256xf32>
    %63 = arith.addf %58, %62 : vector<2x256xf32>
    %c208_i32_5 = arith.constant 208 : i32
    %64 = tpu.dynamic_rotate %49 by %c208_i32_5 dim 1 : vector<2x256xf32>, i32 -> vector<2x256xf32>
    %c12 = arith.constant 12 : index
    %65 = memref.load %arg1[%c12] : memref<27xf32, #tpu.memory_space<smem>>
    %66 = vector.broadcast %65 : f32 to vector<2x256xf32>
    %67 = arith.mulf %64, %66 : vector<2x256xf32>
    %68 = arith.addf %63, %67 : vector<2x256xf32>
    %c205_i32_6 = arith.constant 205 : i32
    %69 = tpu.dynamic_rotate %49 by %c205_i32_6 dim 1 : vector<2x256xf32>, i32 -> vector<2x256xf32>
    %c13 = arith.constant 13 : index
    %70 = memref.load %arg1[%c13] : memref<27xf32, #tpu.memory_space<smem>>
    %71 = vector.broadcast %70 : f32 to vector<2x256xf32>
    %72 = arith.mulf %69, %71 : vector<2x256xf32>
    %73 = arith.addf %68, %72 : vector<2x256xf32>
    %c202_i32_7 = arith.constant 202 : i32
    %74 = tpu.dynamic_rotate %49 by %c202_i32_7 dim 1 : vector<2x256xf32>, i32 -> vector<2x256xf32>
    %c14 = arith.constant 14 : index
    %75 = memref.load %arg1[%c14] : memref<27xf32, #tpu.memory_space<smem>>
    %76 = vector.broadcast %75 : f32 to vector<2x256xf32>
    %77 = arith.mulf %74, %76 : vector<2x256xf32>
    %78 = arith.addf %73, %77 : vector<2x256xf32>
    %c160_i32_8 = arith.constant 160 : i32
    %79 = tpu.dynamic_rotate %49 by %c160_i32_8 dim 1 : vector<2x256xf32>, i32 -> vector<2x256xf32>
    %c15 = arith.constant 15 : index
    %80 = memref.load %arg1[%c15] : memref<27xf32, #tpu.memory_space<smem>>
    %81 = vector.broadcast %80 : f32 to vector<2x256xf32>
    %82 = arith.mulf %79, %81 : vector<2x256xf32>
    %83 = arith.addf %78, %82 : vector<2x256xf32>
    %c157_i32_9 = arith.constant 157 : i32
    %84 = tpu.dynamic_rotate %49 by %c157_i32_9 dim 1 : vector<2x256xf32>, i32 -> vector<2x256xf32>
    %c16 = arith.constant 16 : index
    %85 = memref.load %arg1[%c16] : memref<27xf32, #tpu.memory_space<smem>>
    %86 = vector.broadcast %85 : f32 to vector<2x256xf32>
    %87 = arith.mulf %84, %86 : vector<2x256xf32>
    %88 = arith.addf %83, %87 : vector<2x256xf32>
    %c154_i32_10 = arith.constant 154 : i32
    %89 = tpu.dynamic_rotate %49 by %c154_i32_10 dim 1 : vector<2x256xf32>, i32 -> vector<2x256xf32>
    %c17 = arith.constant 17 : index
    %90 = memref.load %arg1[%c17] : memref<27xf32, #tpu.memory_space<smem>>
    %91 = vector.broadcast %90 : f32 to vector<2x256xf32>
    %92 = arith.mulf %89, %91 : vector<2x256xf32>
    %93 = arith.addf %88, %92 : vector<2x256xf32>
    %94 = vector.extract_strided_slice %0 {offsets = [2, 0, 0], sizes = [1, 2, 256], strides = [1, 1, 1]} : vector<3x2x256xf32> to vector<1x2x256xf32>
    %95 = vector.shape_cast %94 : vector<1x2x256xf32> to vector<2x256xf32>
    %c18 = arith.constant 18 : index
    %96 = memref.load %arg1[%c18] : memref<27xf32, #tpu.memory_space<smem>>
    %97 = vector.broadcast %96 : f32 to vector<2x256xf32>
    %98 = arith.mulf %95, %97 : vector<2x256xf32>
    %99 = arith.addf %93, %98 : vector<2x256xf32>
    %c253_i32_11 = arith.constant 253 : i32
    %100 = tpu.dynamic_rotate %95 by %c253_i32_11 dim 1 : vector<2x256xf32>, i32 -> vector<2x256xf32>
    %c19 = arith.constant 19 : index
    %101 = memref.load %arg1[%c19] : memref<27xf32, #tpu.memory_space<smem>>
    %102 = vector.broadcast %101 : f32 to vector<2x256xf32>
    %103 = arith.mulf %100, %102 : vector<2x256xf32>
    %104 = arith.addf %99, %103 : vector<2x256xf32>
    %c250_i32_12 = arith.constant 250 : i32
    %105 = tpu.dynamic_rotate %95 by %c250_i32_12 dim 1 : vector<2x256xf32>, i32 -> vector<2x256xf32>
    %c20 = arith.constant 20 : index
    %106 = memref.load %arg1[%c20] : memref<27xf32, #tpu.memory_space<smem>>
    %107 = vector.broadcast %106 : f32 to vector<2x256xf32>
    %108 = arith.mulf %105, %107 : vector<2x256xf32>
    %109 = arith.addf %104, %108 : vector<2x256xf32>
    %c208_i32_13 = arith.constant 208 : i32
    %110 = tpu.dynamic_rotate %95 by %c208_i32_13 dim 1 : vector<2x256xf32>, i32 -> vector<2x256xf32>
    %c21 = arith.constant 21 : index
    %111 = memref.load %arg1[%c21] : memref<27xf32, #tpu.memory_space<smem>>
    %112 = vector.broadcast %111 : f32 to vector<2x256xf32>
    %113 = arith.mulf %110, %112 : vector<2x256xf32>
    %114 = arith.addf %109, %113 : vector<2x256xf32>
    %c205_i32_14 = arith.constant 205 : i32
    %115 = tpu.dynamic_rotate %95 by %c205_i32_14 dim 1 : vector<2x256xf32>, i32 -> vector<2x256xf32>
    %c22 = arith.constant 22 : index
    %116 = memref.load %arg1[%c22] : memref<27xf32, #tpu.memory_space<smem>>
    %117 = vector.broadcast %116 : f32 to vector<2x256xf32>
    %118 = arith.mulf %115, %117 : vector<2x256xf32>
    %119 = arith.addf %114, %118 : vector<2x256xf32>
    %c202_i32_15 = arith.constant 202 : i32
    %120 = tpu.dynamic_rotate %95 by %c202_i32_15 dim 1 : vector<2x256xf32>, i32 -> vector<2x256xf32>
    %c23 = arith.constant 23 : index
    %121 = memref.load %arg1[%c23] : memref<27xf32, #tpu.memory_space<smem>>
    %122 = vector.broadcast %121 : f32 to vector<2x256xf32>
    %123 = arith.mulf %120, %122 : vector<2x256xf32>
    %124 = arith.addf %119, %123 : vector<2x256xf32>
    %c160_i32_16 = arith.constant 160 : i32
    %125 = tpu.dynamic_rotate %95 by %c160_i32_16 dim 1 : vector<2x256xf32>, i32 -> vector<2x256xf32>
    %c24 = arith.constant 24 : index
    %126 = memref.load %arg1[%c24] : memref<27xf32, #tpu.memory_space<smem>>
    %127 = vector.broadcast %126 : f32 to vector<2x256xf32>
    %128 = arith.mulf %125, %127 : vector<2x256xf32>
    %129 = arith.addf %124, %128 : vector<2x256xf32>
    %c157_i32_17 = arith.constant 157 : i32
    %130 = tpu.dynamic_rotate %95 by %c157_i32_17 dim 1 : vector<2x256xf32>, i32 -> vector<2x256xf32>
    %c25 = arith.constant 25 : index
    %131 = memref.load %arg1[%c25] : memref<27xf32, #tpu.memory_space<smem>>
    %132 = vector.broadcast %131 : f32 to vector<2x256xf32>
    %133 = arith.mulf %130, %132 : vector<2x256xf32>
    %134 = arith.addf %129, %133 : vector<2x256xf32>
    %c154_i32_18 = arith.constant 154 : i32
    %135 = tpu.dynamic_rotate %95 by %c154_i32_18 dim 1 : vector<2x256xf32>, i32 -> vector<2x256xf32>
    %c26 = arith.constant 26 : index
    %136 = memref.load %arg1[%c26] : memref<27xf32, #tpu.memory_space<smem>>
    %137 = vector.broadcast %136 : f32 to vector<2x256xf32>
    %138 = arith.mulf %135, %137 : vector<2x256xf32>
    %139 = arith.addf %134, %138 : vector<2x256xf32>
    %c0_19 = arith.constant 0 : index
    %c0_20 = arith.constant 0 : index
    %140 = vector.load %arg3[%c0_19, %c0_20] : memref<2x256xf32, #tpu.memory_space<vmem>>, vector<2x256xf32>
    tpu.vector_store %arg3[%c0_19, %c0_20], %139 {strides = array<i32>} : memref<2x256xf32, #tpu.memory_space<vmem>>, vector<2x256xf32>,
    return
  }
  func.func @transform_0(%arg0: i32) -> i32 {
    %c0_i32 = arith.constant 0 : i32
    %c0_i32_0 = arith.constant 0 : i32
    return %c0_i32 : i32
  }
  func.func @transform_1(%arg0: i32) -> (i32, i32, i32) {
    %c0_i32 = arith.constant 0 : i32
    %c0_i32_0 = arith.constant 0 : i32
    %c0_i32_1 = arith.constant 0 : i32
    return %c0_i32, %arg0, %c0_i32_0 : i32, i32, i32
  }
  func.func @transform_2(%arg0: i32) -> (i32, i32) {
    %c0_i32 = arith.constant 0 : i32
    %c0_i32_0 = arith.constant 0 : i32
    return %arg0, %c0_i32 : i32, i32
  }
}

</mosaic_0001>

<bundles_post_ra>
// kernel: tpu_custom_call.1
= control target key start
LH: loop header
LB: loop body
LE: loop exit
PB: predicated region body
PF: predicated region fallthrough
CT: control target
= control target key end

     0   :  { %7 = vsyncpa [#allocation5], 0  ;;  %s1087_s0 = inlined_call_operand.hbm [shape: f32[27], index: 0, kind: input, shape index: {}]   ;;  %s1088_s1 = inlined_call_operand.hbm [shape: f32[3,2,256], index: 1, kind: input, shape index: {}]   ;;  %s1089_s2 = inlined_call_operand.hbm [shape: f32[2,256], index: 2, kind: output, shape index: {}]  }
   0x1   :  { %8 = vsyncpa [#allocation3], 0 }
   0x2   :  { %9 = vsyncpa [#allocation4], 0  ;;  %s15_s11 = sshll.u32 %s1087_s0, 4  ;;  %s23_s14 = sshll.u32 %s1088_s1, 4  ;;  %s16_s11 = int_to_ptr.hbm [resolvable:$true] %s15_s11  ;;  %s24_s14 = int_to_ptr.hbm [resolvable:$true] %s23_s14 }
   0x3   :  { %s698_s15 = smov [#allocation2]   ;;  %s699_s16 = smov [#allocation6]  }
   0x4   :  { %18 = dma.hbm_to_smem %s16_s11, 16, %s698_s15, [#allocation5]  }
   0x5   :  { %s25_s17 = sshll.u32 %s699_s16, 4  ;;  %s700_s18 = smov 64   ;;  %s26_s17 = int_to_ptr.vmem [resolvable:$true] %s25_s17 }
   0x6   :  { %s701_s19 = smov 4  }
   0x7   :  { %31 = dma.hbm_to_vmem [thread:$0]  %s24_s14, 192, %s26_s17, [#allocation3], %s700_s18, %s700_s18, %s701_s19  }
   0x8   :  { %692 = dma.done.wait [#allocation5], 16  }
   0x9   :  { %693 = vsyncadd [#allocation5], 4294967280 }
   0xa   :  { %694 = dma.done.wait [#allocation3], 192  }
   0xb   :  { %695 = vsyncadd [#allocation3], 4294967104 }
   0xc   :  { %40 = sfence }
   0xd   :  { %v732_v0 = vld [vmem:[#allocation6] sm:$0xf]  ;;  %s702_s0 = smov 125   ;;  %s703_s1 = smov 122   ;;  %v756_v15 = vld [vmem:[#allocation6 + $0x4] sm:$0xf]  ;;  %v58_v32 = vlaneseq }
   0xe   :  { %49 = vst [vmem:[#allocation1] ss:$4 sm:$0xff] %v732_v0  ;;  %s704_s20 = smov 80   ;;  %s705_s21 = smov 77   ;;  %v784_v36 = vld [vmem:[#allocation6 + $0x8] sm:$0xf] }
   0xf   :  { %s706_s22 = smov 74   ;;  %s707_s23 = smov 32   ;;  %v782_v35 = vand.u32 127, %v58_v32  ;;  %vm70_vm2 = vcmask 1041408  }
  0x10   :  { %s708_s24 = smov 29   ;;  %s709_s25 = smov 26  }
  0x11   :  { %s595_s26 = sld [smem:[#allocation2 + $0x3]]  ;;  %vm60_vm0 = vcmp.lt.s32.totalorder %v782_v35, 125  ;;  %vm105_vm1 = vcmp.lt.s32.totalorder %v782_v35, 80  ;;  %vm83_vm3 = vcmp.lt.s32.totalorder %v782_v35, 122  ;;  %vm127_vm4 = vcmp.lt.s32.totalorder %v782_v35, 77 }
  0x12   :  { %s593_s27 = sld [smem:[#allocation2 + $0x1]]  ;;  %vm149_vm5 = vcmp.lt.s32.totalorder %v782_v35, 74  ;;  %vm171_vm6 = vcmp.lt.s32.totalorder %v782_v35, 32  ;;  %vm193_vm7 = vcmp.lt.s32.totalorder %v782_v35, 29  ;;  %vm215_vm8 = vcmp.lt.s32.totalorder %v782_v35, 26 }
  0x13   :  { %s786_s28 = sld [smem:[#allocation2]] }
  0x14   :  { %s594_s29 = sld [smem:[#allocation2 + $0x2]] }
  0x15   :  { %v50_v1 = vld.sshfl [vmem:[#allocation1] sm:$0xff pattern:$0x73625140]  ;;  %v51_v2 = vld.sshfl [vmem:[#allocation1 + $0x8] sm:$0xff pattern:$0x73625140] }
  0x16   :  { %54 = vrot.lane.b32.xlu0 %v50_v1, %s702_s0  ;;  %74 = vst [vmem:[#allocation1] ss:$4 sm:$0xff] %v732_v0  ;;  %s596_s30 = sld [smem:[#allocation2 + $0x4]] }
  0x17   :  { %v109_v39 = vstv %s595_s26  ;;  %s597_s3 = sld [smem:[#allocation2 + $0x5]] }
  0x18   :  { %v64_v41 = vstv %s593_s27  ;;  %s598_s4 = sld [smem:[#allocation2 + $0x6]]  ;;  %s582_s27 = sshll.u32 %s1089_s2, 4  ;;  %s583_s27 = int_to_ptr.hbm [resolvable:$true] %s582_s27 }
  0x19   :  { %v45_v53 = vstv %s786_s28  ;;  %s599_s5 = sld [smem:[#allocation2 + $0x7]] }
  0x1a   :  { %v46_v59 = vmul.f32 %v45_v53, %v732_v0  ;;  %v87_v60 = vstv %s594_s29  ;;  %s600_s6 = sld [smem:[#allocation2 + $0x8]] }
  0x1b   :  { %s885_s7 = sld [smem:[#allocation2 + $0xa]] }
  0x1c   :  { %s601_s8 = sld [smem:[#allocation2 + $0x9]] }
  0x1d   :  { %v75_v3 = vld.sshfl [vmem:[#allocation1] sm:$0xff pattern:$0x73625140]  ;;  %v76_v4 = vld.sshfl [vmem:[#allocation1 + $0x8] sm:$0xff pattern:$0x73625140] }
  0x1e   :  { %79 = vrot.lane.b32.xlu1 %v75_v3, %s703_s1  ;;  %56 = vrot.lane.b32.xlu0 %v51_v2, %s702_s0  ;;  %96 = vst [vmem:[#allocation1] ss:$4 sm:$0xff] %v732_v0  ;;  %s894_s9 = sld [smem:[#allocation2 + $0xb]] }
  0x1f   :  { %s903_s10 = sld [smem:[#allocation2 + $0xc]] }
  0x20   :  { %s905_s11 = sld [smem:[#allocation2 + $0xd]] }
  0x21   :  { %s919_s12 = sld [smem:[#allocation2 + $0xe]] }
  0x22   :  { %s922_s13 = sld [smem:[#allocation2 + $0xf]] }
  0x23   :  { %s935_s14 = sld [smem:[#allocation2 + $0x10]] }
  0x24   :  { %s942_s15 = sld [smem:[#allocation2 + $0x11]] }
  0x25   :  { %v97_v5 = vld.sshfl [vmem:[#allocation1] sm:$0xff pattern:$0x73625140]  ;;  %v98_v6 = vld.sshfl [vmem:[#allocation1 + $0x8] sm:$0xff pattern:$0x73625140] }
  0x26   :  { %81 = vrot.lane.b32.xlu1 %v76_v4, %s703_s1  ;;  %118 = vst [vmem:[#allocation1] ss:$4 sm:$0xff] %v732_v0  ;;  %101 = vrot.lane.b32.xlu2 %v97_v5, %s704_s20  ;;  %s979_s16 = sld [smem:[#allocation2 + $0x13]] }
  0x27   :  { %s990_s17 = sld [smem:[#allocation2 + $0x14]] }
  0x28   :  { %s993_s18 = sld [smem:[#allocation2 + $0x12]] }
  0x29   :  { %s999_s19 = sld [smem:[#allocation2 + $0x15]] }
  0x2d   :  { %v119_v7 = vld.sshfl [vmem:[#allocation1] sm:$0xff pattern:$0x73625140]  ;;  %v120_v8 = vld.sshfl [vmem:[#allocation1 + $0x8] sm:$0xff pattern:$0x73625140] }
  0x2e   :  { %123 = vrot.lane.b32.xlu0 %v119_v7, %s705_s21  ;;  %125 = vrot.lane.b32.xlu1 %v120_v8, %s705_s21  ;;  %140 = vst [vmem:[#allocation1] ss:$4 sm:$0xff] %v732_v0  ;;  %v131_v8 = vstv %s596_s30 }
  0x2f   :  { %103 = vrot.lane.b32.xlu2 %v98_v6, %s704_s20 }
  0x35   :  { %v142_v9 = vld.sshfl [vmem:[#allocation1 + $0x8] sm:$0xff pattern:$0x73625140]  ;;  %v141_v10 = vld.sshfl [vmem:[#allocation1] sm:$0xff pattern:$0x73625140] }
  0x36   :  { %147 = vrot.lane.b32.xlu0 %v142_v9, %s706_s22  ;;  %162 = vst [vmem:[#allocation1] ss:$4 sm:$0xff] %v732_v0 }
  0x37   :  { %145 = vrot.lane.b32.xlu2 %v141_v10, %s706_s22 }
  0x3d   :  { %v163_v11 = vld.sshfl [vmem:[#allocation1] sm:$0xff pattern:$0x73625140]  ;;  %v164_v12 = vld.sshfl [vmem:[#allocation1 + $0x8] sm:$0xff pattern:$0x73625140] }
  0x3e   :  { %167 = vrot.lane.b32.xlu1 %v163_v11, %s707_s23  ;;  %184 = vst [vmem:[#allocation1] ss:$4 sm:$0xff] %v732_v0 }
  0x3f   :  { %169 = vrot.lane.b32.xlu2 %v164_v12, %s707_s23 }
  0x45   :  { %v185_v13 = vld.sshfl [vmem:[#allocation1] sm:$0xff pattern:$0x73625140]  ;;  %v186_v14 = vld.sshfl [vmem:[#allocation1 + $0x8] sm:$0xff pattern:$0x73625140] }
  0x46   :  { %189 = vrot.lane.b32.xlu0 %v185_v13, %s708_s24  ;;  %191 = vrot.lane.b32.xlu1 %v186_v14, %s708_s24  ;;  %206 = vst [vmem:[#allocation1] ss:$4 sm:$0xff] %v732_v0 }
  0x4d   :  { %v208_v16 = vld.sshfl [vmem:[#allocation1 + $0x8] sm:$0xff pattern:$0x73625140]  ;;  %v207_v17 = vld.sshfl [vmem:[#allocation1] sm:$0xff pattern:$0x73625140] }
  0x4e   :  { %213 = vrot.lane.b32.xlu0 %v208_v16, %s709_s25  ;;  %233 = vst [vmem:[#allocation1] ss:$4 sm:$0xff] %v756_v15  ;;  %211 = vrot.lane.b32.xlu2 %v207_v17, %s709_s25 }
  0x55   :  { %v234_v18 = vld.sshfl [vmem:[#allocation1] sm:$0xff pattern:$0x73625140]  ;;  %v235_v19 = vld.sshfl [vmem:[#allocation1 + $0x8] sm:$0xff pattern:$0x73625140] }
  0x56   :  { %238 = vrot.lane.b32.xlu1 %v234_v18, %s702_s0  ;;  %254 = vst [vmem:[#allocation1] ss:$4 sm:$0xff] %v756_v15  ;;  %240 = vrot.lane.b32.xlu2 %v235_v19, %s702_s0 }
  0x5d   :  { %v255_v20 = vld.sshfl [vmem:[#allocation1] sm:$0xff pattern:$0x73625140]  ;;  %v256_v21 = vld.sshfl [vmem:[#allocation1 + $0x8] sm:$0xff pattern:$0x73625140] }
  0x5e   :  { %259 = vrot.lane.b32.xlu0 %v255_v20, %s703_s1  ;;  %261 = vrot.lane.b32.xlu1 %v256_v21, %s703_s1  ;;  %275 = vst [vmem:[#allocation1] ss:$4 sm:$0xff] %v756_v15 }
  0x65   :  { %v277_v22 = vld.sshfl [vmem:[#allocation1 + $0x8] sm:$0xff pattern:$0x73625140]  ;;  %v276_v23 = vld.sshfl [vmem:[#allocation1] sm:$0xff pattern:$0x73625140] }
  0x66   :  { %282 = vrot.lane.b32.xlu0 %v277_v22, %s704_s20  ;;  %296 = vst [vmem:[#allocation1] ss:$4 sm:$0xff] %v756_v15  ;;  %280 = vrot.lane.b32.xlu2 %v276_v23, %s704_s20  ;;  %v153_v22 = vstv %s597_s3 }
  0x6d   :  { %v297_v24 = vld.sshfl [vmem:[#allocation1] sm:$0xff pattern:$0x73625140]  ;;  %v298_v25 = vld.sshfl [vmem:[#allocation1 + $0x8] sm:$0xff pattern:$0x73625140] }
  0x6e   :  { %301 = vrot.lane.b32.xlu1 %v297_v24, %s705_s21  ;;  %317 = vst [vmem:[#allocation1] ss:$4 sm:$0xff] %v756_v15  ;;  %303 = vrot.lane.b32.xlu2 %v298_v25, %s705_s21 }
  0x75   :  { %v319_v26 = vld.sshfl [vmem:[#allocation1 + $0x8] sm:$0xff pattern:$0x73625140]  ;;  %v318_v27 = vld.sshfl [vmem:[#allocation1] sm:$0xff pattern:$0x73625140] }
  0x76   :  { %324 = vrot.lane.b32.xlu1 %v319_v26, %s706_s22  ;;  %322 = vrot.lane.b32.xlu0 %v318_v27, %s706_s22  ;;  %338 = vst [vmem:[#allocation1] ss:$4 sm:$0xff] %v756_v15 }
  0x7d   :  { %v340_v28 = vld.sshfl [vmem:[#allocation1 + $0x8] sm:$0xff pattern:$0x73625140]  ;;  %v339_v29 = vld.sshfl [vmem:[#allocation1] sm:$0xff pattern:$0x73625140] }
  0x7e   :  { %345 = vrot.lane.b32.xlu0 %v340_v28, %s707_s23  ;;  %359 = vst [vmem:[#allocation1] ss:$4 sm:$0xff] %v756_v15  ;;  %343 = vrot.lane.b32.xlu2 %v339_v29, %s707_s23 }
  0x80   :  { %v102_v33 = vpop.permute.xlu2 %101 }
  0x85   :  { %v360_v30 = vld.sshfl [vmem:[#allocation1] sm:$0xff pattern:$0x73625140]  ;;  %v361_v31 = vld.sshfl [vmem:[#allocation1 + $0x8] sm:$0xff pattern:$0x73625140] }
  0x86   :  { %364 = vrot.lane.b32.xlu1 %v360_v30, %s708_s24  ;;  %380 = vst [vmem:[#allocation1] ss:$4 sm:$0xff] %v756_v15  ;;  %366 = vrot.lane.b32.xlu2 %v361_v31, %s708_s24 }
  0x88   :  { %v55_v34 = vpop.permute.xlu0 %54 }
  0x89   :  { %v104_v40 = vpop.permute.xlu2 %103 }
  0x8a   :  { %v106_v42 = vsel %vm105_vm1, %v102_v33, %v104_v40  ;;  %v107_v43 = vsel %vm105_vm1, %v104_v40, %v102_v33 }
  0x8b   :  { %v110_v46 = vmul.f32 %v109_v39, %v106_v42  ;;  %v111_v47 = vmul.f32 %v109_v39, %v107_v43 }
  0x8d   :  { %v382_v37 = vld.sshfl [vmem:[#allocation1 + $0x8] sm:$0xff pattern:$0x73625140]  ;;  %v381_v38 = vld.sshfl [vmem:[#allocation1] sm:$0xff pattern:$0x73625140] }
  0x8e   :  { %387 = vrot.lane.b32.xlu1 %v382_v37, %s709_s25  ;;  %385 = vrot.lane.b32.xlu0 %v381_v38, %s709_s25  ;;  %406 = vst [vmem:[#allocation1] ss:$4 sm:$0xff] %v784_v36  ;;  %v114_v52 = vrot.slane %v111_v47, 6 }
  0x90   :  { %v80_v44 = vpop.permute.xlu1 %79  ;;  %v57_v45 = vpop.permute.xlu0 %56  ;;  %v115_v55 = vsel %vm70_vm2, %v110_v46, %v114_v52 }
  0x91   :  { %v61_v48 = vsel %vm60_vm0, %v55_v34, %v57_v45  ;;  %v62_v49 = vsel %vm60_vm0, %v57_v45, %v55_v34  ;;  %v146_v24 = vpop.permute.xlu2 %145 }
  0x92   :  { %v65_v50 = vmul.f32 %v64_v41, %v61_v48  ;;  %v66_v51 = vmul.f32 %v64_v41, %v62_v49 }
  0x94   :  { %v69_v54 = vrot.slane %v66_v51, 6 }
  0x95   :  { %v408_v56 = vld.sshfl [vmem:[#allocation1 + $0x8] sm:$0xff pattern:$0x73625140]  ;;  %v407_v57 = vld.sshfl [vmem:[#allocation1] sm:$0xff pattern:$0x73625140] }
  0x96   :  { %413 = vrot.lane.b32.xlu0 %v408_v56, %s702_s0  ;;  %427 = vst [vmem:[#allocation1] ss:$4 sm:$0xff] %v784_v36  ;;  %v71_v58 = vsel %vm70_vm2, %v65_v50, %v69_v54  ;;  %411 = vrot.lane.b32.xlu2 %v407_v57, %s702_s0  ;;  %s1006_s0 = sld [smem:[#allocation2 + $0x16]] }
  0x97   :  { %v73_v3 = vadd.f32 %v71_v58, %v46_v59 }
  0x98   :  { %v82_v61 = vpop.permute.xlu1 %81 }
  0x99   :  { %v84_v62 = vsel %vm83_vm3, %v80_v44, %v82_v61  ;;  %v85_v63 = vsel %vm83_vm3, %v82_v61, %v80_v44  ;;  %v170_v45 = vpop.permute.xlu2 %169  ;;  %v175_v61 = vstv %s598_s4 }
  0x9a   :  { %v88_v1 = vmul.f32 %v87_v60, %v84_v62  ;;  %v89_v2 = vmul.f32 %v87_v60, %v85_v63 }
  0x9c   :  { %v92_v4 = vrot.slane %v89_v2, 6 }
  0x9d   :  { %v428_v5 = vld.sshfl [vmem:[#allocation1] sm:$0xff pattern:$0x73625140]  ;;  %v429_v6 = vld.sshfl [vmem:[#allocation1 + $0x8] sm:$0xff pattern:$0x73625140] }
  0x9e   :  { %432 = vrot.lane.b32.xlu1 %v428_v5, %s703_s1  ;;  %448 = vst [vmem:[#allocation1] ss:$4 sm:$0xff] %v784_v36  ;;  %v93_v0 = vsel %vm70_vm2, %v88_v1, %v92_v4  ;;  %434 = vrot.lane.b32.xlu2 %v429_v6, %s703_s1  ;;  %v197_v4 = vstv %s599_s5  ;;  %s1014_s1 = sld [smem:[#allocation2 + $0x17]] }
  0x9f   :  { %v95_v7 = vadd.f32 %v93_v0, %v73_v3 }
  0xa0   :  { %v124_v9 = vpop.permute.xlu0 %123  ;;  %v126_v10 = vpop.permute.xlu1 %125 }
  0xa1   :  { %v117_v11 = vadd.f32 %v115_v55, %v95_v7  ;;  %v128_v12 = vsel %vm127_vm4, %v124_v9, %v126_v10  ;;  %v129_v13 = vsel %vm127_vm4, %v126_v10, %v124_v9  ;;  %v219_v10 = vstv %s600_s6 }
  0xa2   :  { %v132_v14 = vmul.f32 %v131_v8, %v128_v12  ;;  %v133_v16 = vmul.f32 %v131_v8, %v129_v13 }
  0xa4   :  { %v136_v17 = vrot.slane %v133_v16, 6 }
  0xa5   :  { %v450_v18 = vld.sshfl [vmem:[#allocation1 + $0x8] sm:$0xff pattern:$0x73625140]  ;;  %v449_v19 = vld.sshfl [vmem:[#allocation1] sm:$0xff pattern:$0x73625140] }
  0xa6   :  { %455 = vrot.lane.b32.xlu1 %v450_v18, %s704_s20  ;;  %453 = vrot.lane.b32.xlu0 %v449_v19, %s704_s20  ;;  %469 = vst [vmem:[#allocation1] ss:$4 sm:$0xff] %v784_v36  ;;  %v137_v20 = vsel %vm70_vm2, %v132_v14, %v136_v17  ;;  %s1022_s20 = sld [smem:[#allocation2 + $0x18]] }
  0xa7   :  { %v139_v21 = vadd.f32 %v137_v20, %v117_v11 }
  0xa8   :  { %v148_v23 = vpop.permute.xlu0 %147  ;;  %v212_v48 = vpop.permute.xlu2 %211 }
  0xa9   :  { %v150_v25 = vsel %vm149_vm5, %v146_v24, %v148_v23  ;;  %v151_v26 = vsel %vm149_vm5, %v148_v23, %v146_v24 }
  0xaa   :  { %v154_v27 = vmul.f32 %v153_v22, %v150_v25  ;;  %v155_v28 = vmul.f32 %v153_v22, %v151_v26  ;;  %v245_v25 = vstv %s885_s7 }
  0xac   :  { %v158_v29 = vrot.slane %v155_v28, 6 }
  0xad   :  { %v471_v30 = vld.sshfl [vmem:[#allocation1 + $0x8] sm:$0xff pattern:$0x73625140]  ;;  %v470_v31 = vld.sshfl [vmem:[#allocation1] sm:$0xff pattern:$0x73625140] }
  0xae   :  { %476 = vrot.lane.b32.xlu0 %v471_v30, %s705_s21  ;;  %490 = vst [vmem:[#allocation1] ss:$4 sm:$0xff] %v784_v36  ;;  %v159_v32 = vsel %vm70_vm2, %v154_v27, %v158_v29  ;;  %474 = vrot.lane.b32.xlu2 %v470_v31, %s705_s21  ;;  %v229_v29 = vstv %s601_s8  ;;  %s1035_s21 = sld [smem:[#allocation2 + $0x19]] }
  0xaf   :  { %v835_v33 = vadd.f32 %v159_v32, %v139_v21 }
  0xb0   :  { %v168_v42 = vpop.permute.xlu1 %167  ;;  %v241_v51 = vpop.permute.xlu2 %240 }
  0xb1   :  { %v173_v62 = vsel %vm171_vm6, %v170_v45, %v168_v42  ;;  %v172_v3 = vsel %vm171_vm6, %v168_v42, %v170_v45  ;;  %v287_v45 = vstv %s903_s10 }
  0xb2   :  { %v177_v2 = vmul.f32 %v175_v61, %v173_v62  ;;  %v176_v0 = vmul.f32 %v175_v61, %v172_v3  ;;  %v329_v62 = vstv %s919_s12 }
  0xb4   :  { %v180_v7 = vrot.slane %v177_v2, 6 }
  0xb5   :  { %v491_v34 = vld.sshfl [vmem:[#allocation1] sm:$0xff pattern:$0x73625140]  ;;  %v492_v37 = vld.sshfl [vmem:[#allocation1 + $0x8] sm:$0xff pattern:$0x73625140] }
  0xb6   :  { %495 = vrot.lane.b32.xlu1 %v491_v34, %s706_s22  ;;  %511 = vst [vmem:[#allocation1] ss:$4 sm:$0xff] %v784_v36  ;;  %497 = vrot.lane.b32.xlu2 %v492_v37, %s706_s22  ;;  %v181_v13 = vsel %vm70_vm2, %v176_v0, %v180_v7  ;;  %v266_v34 = vstv %s894_s9  ;;  %v350_v7 = vstv %s922_s13  ;;  %s1064_s22 = sld [smem:[#allocation2 + $0x1a]] }
  0xb7   :  { %v183_v21 = vadd.f32 %v181_v13, %v835_v33 }
  0xb8   :  { %v190_v46 = vpop.permute.xlu0 %189  ;;  %v192_v47 = vpop.permute.xlu1 %191 }
  0xb9   :  { %v195_v5 = vsel %vm193_vm7, %v192_v47, %v190_v46  ;;  %v194_v9 = vsel %vm193_vm7, %v190_v46, %v192_v47  ;;  %v308_v47 = vstv %s905_s11 }
  0xba   :  { %v199_v8 = vmul.f32 %v197_v4, %v195_v5  ;;  %v198_v14 = vmul.f32 %v197_v4, %v194_v9 }
  0xbc   :  { %v202_v16 = vrot.slane %v199_v8, 6 }
  0xbd   :  { %v513_v38 = vld.sshfl [vmem:[#allocation1 + $0x8] sm:$0xff pattern:$0x73625140]  ;;  %v512_v39 = vld.sshfl [vmem:[#allocation1] sm:$0xff pattern:$0x73625140] }
  0xbe   :  { %518 = vrot.lane.b32.xlu1 %v513_v38, %s707_s23  ;;  %516 = vrot.lane.b32.xlu0 %v512_v39, %s707_s23  ;;  %532 = vst [vmem:[#allocation1] ss:$4 sm:$0xff] %v784_v36  ;;  %v203_v22 = vsel %vm70_vm2, %v198_v14, %v202_v16  ;;  %v230_v39 = vmul.f32 %v229_v29, %v756_v15  ;;  %s710_s23 = smov [#allocation7]  }
  0xbf   :  { %v205_v27 = vadd.f32 %v203_v22, %v183_v21  ;;  %v392_v22 = vstv %s942_s15 }
  0xc0   :  { %v214_v49 = vpop.permute.xlu0 %213  ;;  %v852_v54 = vpop.permute.xlu2 %280 }
  0xc1   :  { %v217_v11 = vsel %vm215_vm8, %v214_v49, %v212_v48  ;;  %v216_v19 = vsel %vm215_vm8, %v212_v48, %v214_v49 }
  0xc2   :  { %v221_v17 = vmul.f32 %v219_v10, %v217_v11  ;;  %v220_v23 = vmul.f32 %v219_v10, %v216_v19 }
  0xc4   :  { %v224_v24 = vrot.slane %v221_v17, 6 }
  0xc5   :  { %v534_v40 = vld.sshfl [vmem:[#allocation1 + $0x8] sm:$0xff pattern:$0x73625140]  ;;  %v533_v41 = vld.sshfl [vmem:[#allocation1] sm:$0xff pattern:$0x73625140] }
  0xc6   :  { %539 = vrot.lane.b32.xlu0 %v534_v40, %s708_s24  ;;  %553 = vst [vmem:[#allocation1] ss:$4 sm:$0xff] %v784_v36  ;;  %537 = vrot.lane.b32.xlu2 %v533_v41, %s708_s24  ;;  %v225_v28 = vsel %vm70_vm2, %v220_v23, %v224_v24  ;;  %s580_s24 = sshll.u32 %s710_s23, 4  ;;  %s581_s24 = int_to_ptr.vmem [resolvable:$true] %s580_s24 }
  0xc7   :  { %v227_v38 = vadd.f32 %v225_v28, %v205_v27 }
  0xc8   :  { %v239_v50 = vpop.permute.xlu1 %238  ;;  %v858_v57 = vpop.permute.xlu2 %303 }
  0xc9   :  { %v243_v26 = vsel %vm60_vm0, %v241_v51, %v239_v50  ;;  %v242_v33 = vsel %vm60_vm0, %v239_v50, %v241_v51  ;;  %v231_v15 = vadd.f32 %v230_v39, %v227_v38  ;;  %v418_v39 = vstv %s979_s16 }
  0xca   :  { %v247_v30 = vmul.f32 %v245_v25, %v243_v26  ;;  %v246_v40 = vmul.f32 %v245_v25, %v242_v33 }
  0xcc   :  { %v250_v41 = vrot.slane %v247_v30, 6 }
  0xcd   :  { %v554_v43 = vld.sshfl [vmem:[#allocation1] sm:$0xff pattern:$0x73625140]  ;;  %v555_v44 = vld.sshfl [vmem:[#allocation1 + $0x8] sm:$0xff pattern:$0x73625140] }
  0xce   :  { %558 = vrot.lane.b32.xlu1 %v554_v43, %s709_s25  ;;  %560 = vrot.lane.b32.xlu2 %v555_v44, %s709_s25  ;;  %v251_v49 = vsel %vm70_vm2, %v246_v40, %v250_v41 }
  0xcf   :  { %v253_v5 = vadd.f32 %v251_v49, %v231_v15 }
  0xd0   :  { %v848_v52 = vpop.permute.xlu0 %259  ;;  %v850_v53 = vpop.permute.xlu1 %261 }
  0xd1   :  { %v264_v37 = vsel %vm83_vm3, %v850_v53, %v848_v52  ;;  %v263_v44 = vsel %vm83_vm3, %v848_v52, %v850_v53 }
  0xd2   :  { %v268_v42 = vmul.f32 %v266_v34, %v264_v37  ;;  %v267_v50 = vmul.f32 %v266_v34, %v263_v44 }
  0xd4   :  { %v271_v51 = vrot.slane %v268_v42, 6 }
  0xd8   :  { %v854_v55 = vpop.permute.xlu0 %282  ;;  %v864_v60 = vpop.permute.xlu2 %343 }
  0xd9   :  { %v285_v46 = vsel %vm105_vm1, %v854_v55, %v852_v54  ;;  %v284_v61 = vsel %vm105_vm1, %v852_v54, %v854_v55  ;;  %v272_v55 = vsel %vm70_vm2, %v267_v50, %v271_v51  ;;  %v460_v51 = vstv %s999_s19 }
  0xda   :  { %v289_v52 = vmul.f32 %v287_v45, %v285_v46  ;;  %v288_v8 = vmul.f32 %v287_v45, %v284_v61  ;;  %v274_v19 = vadd.f32 %v272_v55, %v253_v5  ;;  %v439_v45 = vstv %s990_s17 }
  0xdc   :  { %v292_v9 = vrot.slane %v289_v52, 6 }
  0xe0   :  { %v856_v56 = vpop.permute.xlu1 %301  ;;  %v879_v6 = vpop.permute.xlu2 %366 }
  0xe1   :  { %v306_v48 = vsel %vm127_vm4, %v858_v57, %v856_v56  ;;  %v305_v0 = vsel %vm127_vm4, %v856_v56, %v858_v57  ;;  %v371_v56 = vstv %s935_s14 }
  0xe2   :  { %v310_v3 = vmul.f32 %v308_v47, %v306_v48  ;;  %v309_v14 = vmul.f32 %v308_v47, %v305_v0  ;;  %v402_v47 = vstv %s993_s18 }
  0xe3   :  { %v403_v0 = vmul.f32 %v402_v47, %v784_v36 }
  0xe4   :  { %v313_v16 = vrot.slane %v310_v3, 6 }
  0xe8   :  { %v860_v58 = vpop.permute.xlu0 %322  ;;  %v862_v59 = vpop.permute.xlu1 %324 }
  0xe9   :  { %v327_v2 = vsel %vm149_vm5, %v862_v59, %v860_v58  ;;  %v326_v13 = vsel %vm149_vm5, %v860_v58, %v862_v59  ;;  %v293_v59 = vsel %vm70_vm2, %v288_v8, %v292_v9 }
  0xea   :  { %v331_v10 = vmul.f32 %v329_v62, %v327_v2  ;;  %v330_v23 = vmul.f32 %v329_v62, %v326_v13  ;;  %v295_v33 = vadd.f32 %v293_v59, %v274_v19  ;;  %v544_v59 = vstv %s1035_s21 }
  0xec   :  { %v334_v24 = vrot.slane %v331_v10, 6 }
  0xf0   :  { %v870_v63 = vpop.permute.xlu0 %345  ;;  %v896_v20 = vpop.permute.xlu2 %411 }
  0xf1   :  { %v348_v54 = vsel %vm171_vm6, %v870_v63, %v864_v60  ;;  %v347_v21 = vsel %vm171_vm6, %v864_v60, %v870_v63  ;;  %v314_v63 = vsel %vm70_vm2, %v309_v14, %v313_v16  ;;  %v523_v16 = vstv %s1022_s20 }
  0xf2   :  { %v352_v17 = vmul.f32 %v350_v7, %v348_v54  ;;  %v351_v26 = vmul.f32 %v350_v7, %v347_v21  ;;  %v316_v38 = vadd.f32 %v314_v63, %v295_v33 }
  0xf4   :  { %v355_v27 = vrot.slane %v352_v17, 6 }
  0xf6   :  { %v356_v41 = vsel %vm70_vm2, %v351_v26, %v355_v27 }
  0xf8   :  { %v872_v1 = vpop.permute.xlu1 %364  ;;  %v924_v43 = vpop.permute.xlu2 %434 }
  0xf9   :  { %v369_v57 = vsel %vm193_vm7, %v879_v6, %v872_v1  ;;  %v368_v60 = vsel %vm193_vm7, %v872_v1, %v879_v6  ;;  %v335_v1 = vsel %vm70_vm2, %v330_v23, %v334_v24 }
  0xfa   :  { %v373_v25 = vmul.f32 %v371_v56, %v369_v57  ;;  %v372_v6 = vmul.f32 %v371_v56, %v368_v60  ;;  %v337_v44 = vadd.f32 %v335_v1, %v316_v38 }
  0xfc   :  { %v376_v37 = vrot.slane %v373_v25, 6  ;;  %v358_v49 = vadd.f32 %v356_v41, %v337_v44 }
  0xfe   :  { %v377_v15 = vsel %vm70_vm2, %v372_v6, %v376_v37 }
  0xff   :  { %v379_v3 = vadd.f32 %v377_v15, %v358_v49 }
 0x100   :  { %v887_v12 = vpop.permute.xlu0 %385  ;;  %v890_v18 = vpop.permute.xlu1 %387 }
 0x101   :  { %v390_v58 = vsel %vm215_vm8, %v890_v18, %v887_v12  ;;  %v389_v34 = vsel %vm215_vm8, %v887_v12, %v890_v18 }
 0x102   :  { %v394_v28 = vmul.f32 %v392_v22, %v390_v58  ;;  %v393_v12 = vmul.f32 %v392_v22, %v389_v34 }
 0x104   :  { %v397_v18 = vrot.slane %v394_v28, 6 }
 0x106   :  { %v398_v61 = vsel %vm70_vm2, %v393_v12, %v397_v18 }
 0x107   :  { %v400_v9 = vadd.f32 %v398_v61, %v379_v3 }
 0x108   :  { %v908_v31 = vpop.permute.xlu0 %413  ;;  %v968_v11 = vpop.permute.xlu2 %474 }
 0x109   :  { %v416_v40 = vsel %vm60_vm0, %v908_v31, %v896_v20  ;;  %v415_v50 = vsel %vm60_vm0, %v896_v20, %v908_v31  ;;  %v481_v20 = vstv %s1006_s0  ;;  %v404_v22 = vadd.f32 %v403_v0, %v400_v9 }
 0x10a   :  { %v420_v48 = vmul.f32 %v418_v39, %v416_v40  ;;  %v419_v7 = vmul.f32 %v418_v39, %v415_v50 }
 0x10c   :  { %v423_v54 = vrot.slane %v420_v48, 6 }
 0x10e   :  { %v424_v19 = vsel %vm70_vm2, %v419_v7, %v423_v54 }
 0x10f   :  { %v426_v63 = vadd.f32 %v424_v19, %v404_v22 }
 0x110   :  { %v910_v32 = vpop.permute.xlu1 %432  ;;  %v498_v42 = vpop.permute.xlu2 %497 }
 0x111   :  { %v437_v46 = vsel %vm83_vm3, %v924_v43, %v910_v32  ;;  %v436_v5 = vsel %vm83_vm3, %v910_v32, %v924_v43  ;;  %v502_v32 = vstv %s1014_s1 }
 0x112   :  { %v441_v62 = vmul.f32 %v439_v45, %v437_v46  ;;  %v440_v13 = vmul.f32 %v439_v45, %v436_v5 }
 0x114   :  { %v444_v56 = vrot.slane %v441_v62, 6 }
 0x116   :  { %v445_v23 = vsel %vm70_vm2, %v440_v13, %v444_v56 }
 0x117   :  { %v447_v34 = vadd.f32 %v445_v23, %v426_v63 }
 0x118   :  { %v945_v53 = vpop.permute.xlu0 %453  ;;  %v956_v4 = vpop.permute.xlu1 %455 }
 0x119   :  { %v458_v52 = vsel %vm105_vm1, %v956_v4, %v945_v53  ;;  %v457_v10 = vsel %vm105_vm1, %v945_v53, %v956_v4 }
 0x11a   :  { %v462_v55 = vmul.f32 %v460_v51, %v458_v52  ;;  %v461_v53 = vmul.f32 %v460_v51, %v457_v10 }
 0x11c   :  { %v465_v4 = vrot.slane %v462_v55, 6 }
 0x11e   :  { %v466_v28 = vsel %vm70_vm2, %v461_v53, %v465_v4 }
 0x11f   :  { %v468_v38 = vadd.f32 %v466_v28, %v447_v34 }
 0x120   :  { %v477_v29 = vpop.permute.xlu0 %476  ;;  %v538_v14 = vpop.permute.xlu2 %537 }
 0x121   :  { %v479_v31 = vsel %vm127_vm4, %v477_v29, %v968_v11  ;;  %v478_v36 = vsel %vm127_vm4, %v968_v11, %v477_v29 }
 0x122   :  { %v483_v57 = vmul.f32 %v481_v20, %v479_v31  ;;  %v482_v24 = vmul.f32 %v481_v20, %v478_v36 }
 0x124   :  { %v486_v11 = vrot.slane %v483_v57, 6 }
 0x126   :  { %v487_v1 = vsel %vm70_vm2, %v482_v24, %v486_v11 }
 0x127   :  { %v489_v18 = vadd.f32 %v487_v1, %v468_v38 }
 0x128   :  { %v496_v30 = vpop.permute.xlu1 %495  ;;  %v561_v12 = vpop.permute.xlu2 %560 }
 0x129   :  { %v500_v43 = vsel %vm149_vm5, %v498_v42, %v496_v30  ;;  %v499_v58 = vsel %vm149_vm5, %v496_v30, %v498_v42  ;;  %v565_v42 = vstv %s1064_s22 }
 0x12a   :  { %v504_v21 = vmul.f32 %v502_v32, %v500_v43  ;;  %v503_v29 = vmul.f32 %v502_v32, %v499_v58 }
 0x12c   :  { %v507_v30 = vrot.slane %v504_v21, 6 }
 0x12e   :  { %v508_v40 = vsel %vm70_vm2, %v503_v29, %v507_v30 }
 0x12f   :  { %v510_v48 = vadd.f32 %v508_v40, %v489_v18 }
 0x130   :  { %v517_v2 = vpop.permute.xlu0 %516  ;;  %v519_v8 = vpop.permute.xlu1 %518 }
 0x131   :  { %v521_v17 = vsel %vm171_vm6, %v519_v8, %v517_v2  ;;  %v520_v26 = vsel %vm171_vm6, %v517_v2, %v519_v8 }
 0x132   :  { %v525_v25 = vmul.f32 %v523_v16, %v521_v17  ;;  %v524_v6 = vmul.f32 %v523_v16, %v520_v26 }
 0x134   :  { %v528_v37 = vrot.slane %v525_v25, 6 }
 0x136   :  { %v529_v46 = vsel %vm70_vm2, %v524_v6, %v528_v37 }
 0x137   :  { %v531_v51 = vadd.f32 %v529_v46, %v510_v48 }
 0x138   :  { %v540_v60 = vpop.permute.xlu0 %539 }
 0x139   :  { %v542_v27 = vsel %vm193_vm7, %v540_v60, %v538_v14  ;;  %v541_v39 = vsel %vm193_vm7, %v538_v14, %v540_v60 }
 0x13a   :  { %v546_v33 = vmul.f32 %v544_v59, %v542_v27  ;;  %v545_v44 = vmul.f32 %v544_v59, %v541_v39 }
 0x13c   :  { %v549_v41 = vrot.slane %v546_v33, 6 }
 0x13e   :  { %v550_v50 = vsel %vm70_vm2, %v545_v44, %v549_v41 }
 0x13f   :  { %v552_v62 = vadd.f32 %v550_v50, %v531_v51 }
 0x140   :  { %v559_v45 = vpop.permute.xlu1 %558 }
 0x141   :  { %v562_v15 = vsel %vm215_vm8, %v559_v45, %v561_v12  ;;  %v563_v47 = vsel %vm215_vm8, %v561_v12, %v559_v45 }
 0x142   :  { %v567_v49 = vmul.f32 %v565_v42, %v563_v47  ;;  %v566_v52 = vmul.f32 %v565_v42, %v562_v15 }
 0x144   :  { %v570_v61 = vrot.slane %v567_v49, 6 }
 0x146   :  { %v571_v2 = vsel %vm70_vm2, %v566_v52, %v570_v61 }
 0x147   :  { %v573_v3 = vadd.f32 %v571_v2, %v552_v62 }
 0x149   :  { %574 = vst [vmem:[#allocation7] sm:$0xf] %v573_v3 }
 0x14a   :  { %585 = dma.vmem_to_hbm [thread:$0]  %s581_s24, 64, %s583_s27, [#allocation4]  }
 0x14b   :  { %696 = dma.done.wait [#allocation4], 64  }
 0x14c   :  { %697 = vsyncadd [#allocation4], 4294967232 }
 0x14d   :  { %590 = vsyncpa [#allocation3], 1 }
 0x14e   :  { %591 = vsyncpa [#allocation4], 1 }
 0x14f   :  { %592 = vsyncpa [#allocation5], 1 }

</bundles_post_ra>
